<compile_context>
chip_gen: v6e
topology: v6e:2x2x1
jax: 0.10.0
libtpu: 0.0.40
codegen_flags: <defaults>
</compile_context>

<pallas_src>
import functools

import jax
import jax.numpy as jnp
from jax.experimental import pallas as pl
from jax.experimental.pallas import tpu as pltpu


def _round_up(x, m):
    return ((x + m - 1) // m) * m


def _vmem_limit_bytes():
    # Generation-aware VMEM budget: leave ~8 MiB headroom below physical capacity
    # (64 MiB/core on v7x, 128 MiB on v5e/v6e); never exceed 112 MiB.
    try:
        cap = int(pltpu.get_tpu_info().vmem_capacity_bytes)
    except Exception:  # conservative fallback (v7x per-core VMEM)
        cap = 64 * 1024 * 1024
    return int(min(max(cap - 8 * 1024 * 1024, 16 * 1024 * 1024), 112 * 1024 * 1024))


# ----------------------------------------------------------------------------
# Fused kernel: C precompute + damped fixed-point solve + final SSELayer + MLP.
# ----------------------------------------------------------------------------
def _sse_fused_kernel(a_ref, nf_ref, aggef_ref, mask_ref,
                      w1_ref, w2n_ref, w2e_ref, b_ref, w2h_ref,
                      wm1_ref, bm1_ref, wm2_ref, bm2_ref,
                      out_ref, itr_ref,
                      h_ref, c_ref, itr_smem, done_smem,
                      *, alpha, tol, max_iter):
    nf = nf_ref[...]
    mask = mask_ref[...]          # (N,1): 1.0 for real rows, 0.0 for padded rows

    # h-independent pre-activation  C = nf@W1 + (A@nf)@W2n + agg_ef@W2e + (b1+b2),
    # computed once.  A stays bf16 on the MXU (nf cast to bf16 for that one matmul).
    anf = jnp.dot(a_ref[...], nf.astype(jnp.bfloat16),
                  preferred_element_type=jnp.float32)
    c_ref[...] = (jnp.dot(nf, w1_ref[...], preferred_element_type=jnp.float32)
                  + jnp.dot(anf, w2n_ref[...], preferred_element_type=jnp.float32)
                  + jnp.dot(aggef_ref[...], w2e_ref[...],
                            preferred_element_type=jnp.float32)
                  + b_ref[...]) * mask

    h_ref[...] = jnp.zeros_like(h_ref)
    itr_smem[0] = 0
    done_smem[0] = 0

    tol2 = jnp.float32(tol) * jnp.float32(tol)
    one_m_alpha = jnp.float32(1.0 - alpha)
    alpha_f = jnp.float32(alpha)

    # Damped fixed-point iteration, fully VMEM-resident.  Once converged, the SMEM gate
    # skips both matmuls of every remaining iteration (the reference breaks out).
    @pl.loop(0, max_iter)
    def _(i):
        @pl.when(done_smem[0] == 0)
        def _():
            h = h_ref[...]
            hw = jnp.dot(h, w2h_ref[...], preferred_element_type=jnp.float32)  # (N,H)@(H,H)
            pre = jnp.dot(a_ref[...], hw.astype(jnp.bfloat16),                 # bf16 MXU
                          preferred_element_type=jnp.float32) + c_ref[...]
            h_next = one_m_alpha * h + alpha_f * jnp.maximum(pre, 0.0)         # ReLU + damp
            d = h - h_next
            conv = jnp.sum(d * d) < tol2

            # Reference semantics: break BEFORE the update (keep old h, don't bump itr).
            @pl.when(conv)
            def _():
                done_smem[0] = 1

            @pl.when(jnp.logical_not(conv))
            def _():
                h_ref[...] = h_next
                itr_smem[0] = itr_smem[0] + 1

    # Final (undamped) SSELayer application on the fixed point.
    h_fp = h_ref[...]
    hw = jnp.dot(h_fp, w2h_ref[...], preferred_element_type=jnp.float32)
    h_final = jnp.maximum(
        jnp.dot(a_ref[...], hw.astype(jnp.bfloat16),
                preferred_element_type=jnp.float32) + c_ref[...], 0.0)

    # MLP regressor: Linear -> ReLU -> Linear  (Wm2/bm2 zero-padded to 128 output lanes so
    # the output store is lane-dense; wrapper slices the real columns).
    z = jnp.maximum(
        jnp.dot(h_final, wm1_ref[...], preferred_element_type=jnp.float32) + bm1_ref[...],
        0.0)
    out_ref[...] = (jnp.dot(z, wm2_ref[...], preferred_element_type=jnp.float32)
                    + bm2_ref[...])

    itr_ref[...] = jnp.full((1, 1), itr_smem[0], dtype=jnp.int32)


# ----------------------------------------------------------------------------
# Wrapper (mirrors SSE.forward / SSE.solve_fp_eq semantics).
# ----------------------------------------------------------------------------
def sse_forward(A, nf, ef, params, *, alpha=0.1, tol=1e-5, max_iter=20):
    n = A.shape[0]
    node_dim = nf.shape[1]
    edge_dim = ef.shape[2]
    h_dim = params["W2h"].shape[0]
    target_dim = params["Wm2"].shape[1]

    n_pad = max(_round_up(n, 16), 16)                 # bf16 sublane packing (16,128)
    out_pad = max(_round_up(target_dim, 128), 128)    # lane-dense output slab

    # Neighbor-summed edge features (one-time, h-independent precompute).
    # TODO(synk): row-tiled Pallas precompute for large N*N*E instead of XLA.
    agg_ef = jnp.einsum("vu,vue->ve", A, ef)

    def pad2(x, r, c):
        return jnp.pad(x, ((0, r - x.shape[0]), (0, c - x.shape[1])))

    a_bf16 = pad2(A, n_pad, n_pad).astype(jnp.bfloat16)   # exact for 0/1 adjacency
    nf_p = pad2(nf, n_pad, node_dim)
    agg_ef_p = pad2(agg_ef, n_pad, edge_dim)
    row_mask = (jnp.arange(n_pad) < n).astype(jnp.float32).reshape(n_pad, 1)

    bias = params["b1"] + params["b2"]
    wm2_p = pad2(params["Wm2"], h_dim, out_pad)
    bm2_p = pad2(params["bm2"], 1, out_pad)

    inputs = (a_bf16, nf_p, agg_ef_p, row_mask,
              params["W1"], params["W2n"], params["W2e"], bias, params["W2h"],
              params["Wm1"], params["bm1"], wm2_p, bm2_p)

    flops = (2 * n_pad * n_pad * node_dim                         # A@nf
             + 4 * n_pad * node_dim * h_dim                       # nf@W1, (A@nf)@W2n
             + 2 * n_pad * edge_dim * h_dim                       # agg_ef@W2e
             + (max_iter + 1) * (2 * n_pad * h_dim * h_dim        # h@W2h
                                 + 2 * n_pad * n_pad * h_dim)     # A@(hW)
             + 2 * n_pad * h_dim * h_dim + 2 * n_pad * h_dim * out_pad)   # MLP
    bytes_accessed = (sum(int(x.size) * x.dtype.itemsize for x in inputs)
                      + n_pad * out_pad * 4 + 4)

    kernel = functools.partial(_sse_fused_kernel, alpha=float(alpha),
                               tol=float(tol), max_iter=int(max_iter))

    vmem = pltpu.MemorySpace.VMEM
    out_full, frd_itr = pl.pallas_call(
        kernel,
        out_shape=(jax.ShapeDtypeStruct((n_pad, out_pad), jnp.float32),
                   jax.ShapeDtypeStruct((1, 1), jnp.int32)),
        in_specs=[pl.BlockSpec(memory_space=vmem) for _ in range(len(inputs))],
        out_specs=(pl.BlockSpec(memory_space=vmem),
                   pl.BlockSpec(memory_space=vmem)),
        scratch_shapes=[pltpu.VMEM((n_pad, h_dim), jnp.float32),  # h (fixed-point state)
                        pltpu.VMEM((n_pad, h_dim), jnp.float32),  # C (constant pre-act)
                        pltpu.SMEM((1,), jnp.int32),              # iteration counter
                        pltpu.SMEM((1,), jnp.int32)],             # converged flag
        compiler_params=pltpu.CompilerParams(vmem_limit_bytes=_vmem_limit_bytes()),
        cost_estimate=pl.CostEstimate(flops=flops, transcendentals=0,
                                      bytes_accessed=bytes_accessed),
    )(*inputs)

    return out_full[:n, :target_dim], frd_itr[0, 0]


# ----------------------------------------------------------------------------
# Pure-JAX f32 reference (for a correctness sanity check).
# ----------------------------------------------------------------------------
def sse_forward_ref(A, nf, ef, params, *, alpha, tol, max_iter):
    agg_ef = jnp.einsum("vu,vue->ve", A, ef)
    bias = params["b1"] + params["b2"]
    C = nf @ params["W1"] + (A @ nf) @ params["W2n"] + agg_ef @ params["W2e"] + bias

    def layer(h):
        return jnp.maximum((A @ h) @ params["W2h"] + C, 0.0)

    h = jnp.zeros((A.shape[0], params["W2h"].shape[0]), jnp.float32)
    itr = 0
    for _ in range(max_iter):
        h_next = (1.0 - alpha) * h + alpha * layer(h)
        if float(jnp.linalg.norm(h - h_next)) < tol:
            break
        h = h_next
        itr += 1
    h = layer(h)
    z = jnp.maximum(h @ params["Wm1"] + params["bm1"], 0.0)
    return z @ params["Wm2"] + params["bm2"], itr


if __name__ == "__main__":
    N, node_dim, edge_dim, hidden_dim, target_dim = 16, 8, 8, 32, 4
    alpha, tol, max_iter = 0.1, 1e-5, 20

    key = jax.random.PRNGKey(0)
    keys = jax.random.split(key, 10)

    # Deterministic synthetic graph: symmetric adjacency, no self loops.
    A = (jax.random.uniform(keys[0], (N, N)) < 0.3).astype(jnp.float32)
    A = jnp.maximum(A, A.T) * (1.0 - jnp.eye(N, dtype=jnp.float32))
    nf = jax.random.normal(keys[1], (N, node_dim), jnp.float32)
    ef = jax.random.normal(keys[2], (N, N, edge_dim), jnp.float32) * A[..., None]

    s = 0.1
    params = {
        # SSELayer parameters (W2h kept small so the damped map is a solid contraction,
        # matching the regime the SSE module is meant to operate in).
        "W1":  jax.random.normal(keys[3], (node_dim, hidden_dim), jnp.float32) * s,
        "b1":  jnp.zeros((1, hidden_dim), jnp.float32),
        "W2h": jax.random.normal(keys[4], (hidden_dim, hidden_dim), jnp.float32) * 0.01,
        "W2n": jax.random.normal(keys[5], (node_dim, hidden_dim), jnp.float32) * s,
        "W2e": jax.random.normal(keys[6], (edge_dim, hidden_dim), jnp.float32) * s,
        "b2":  jnp.zeros((1, hidden_dim), jnp.float32),
        # MLP regressor parameters
        "Wm1": jax.random.normal(keys[7], (hidden_dim, hidden_dim), jnp.float32) * s,
        "bm1": jnp.zeros((1, hidden_dim), jnp.float32),
        "Wm2": jax.random.normal(keys[8], (hidden_dim, target_dim), jnp.float32) * s,
        "bm2": jnp.zeros((1, target_dim), jnp.float32),
    }

    fwd = jax.jit(functools.partial(sse_forward, alpha=alpha, tol=tol, max_iter=max_iter))
    out, frd_itr = fwd(A, nf, ef, params)
    jax.block_until_ready((out, frd_itr))
    assert out.shape == (N, target_dim)
    assert 0 <= int(frd_itr) <= max_iter

    # Sanity check against a pure-JAX f32 reference.  The kernel runs the adjacency
    # matmuls on the bf16 MXU path (per the perf review), so allow bf16-level error.
    with jax.default_matmul_precision("float32"):
        out_ref, _ = sse_forward_ref(A, nf, ef, params,
                                     alpha=alpha, tol=tol, max_iter=max_iter)
    assert jnp.allclose(out, out_ref, atol=2e-2, rtol=2e-2), \
        f"max abs err {float(jnp.max(jnp.abs(out - out_ref)))}"

    print("KERNEL_OK")
</pallas_src>

<mosaic_0001>
module attributes {stable_mosaic.version = 11 : i64} {
  func.func @_sse_fused_kernel(%arg0: memref<16x16xbf16, #tpu.memory_space<vmem>>, %arg1: memref<16x8xf32, #tpu.memory_space<vmem>>, %arg2: memref<16x8xf32, #tpu.memory_space<vmem>>, %arg3: memref<16x1xf32, #tpu.memory_space<vmem>>, %arg4: memref<8x32xf32, #tpu.memory_space<vmem>>, %arg5: memref<8x32xf32, #tpu.memory_space<vmem>>, %arg6: memref<8x32xf32, #tpu.memory_space<vmem>>, %arg7: memref<1x32xf32, #tpu.memory_space<vmem>>, %arg8: memref<32x32xf32, #tpu.memory_space<vmem>>, %arg9: memref<32x32xf32, #tpu.memory_space<vmem>>, %arg10: memref<1x32xf32, #tpu.memory_space<vmem>>, %arg11: memref<32x128xf32, #tpu.memory_space<vmem>>, %arg12: memref<1x128xf32, #tpu.memory_space<vmem>>, %arg13: memref<16x128xf32, #tpu.memory_space<vmem>>, %arg14: memref<1x1xi32, #tpu.memory_space<vmem>>, %arg15: memref<16x32xf32, #tpu.memory_space<vmem>>, %arg16: memref<16x32xf32, #tpu.memory_space<vmem>>, %arg17: memref<1xi32, #tpu.memory_space<smem>>, %arg18: memref<1xi32, #tpu.memory_space<smem>>) attributes {dimension_semantics = [], scalar_prefetch = 0 : i64, scratch_operands = 4 : i64, tpu.core_type = #tpu.core_type<tc>} {
    %c0 = arith.constant 0 : index
    %c0_0 = arith.constant 0 : index
    %0 = vector.load %arg1[%c0, %c0_0] : memref<16x8xf32, #tpu.memory_space<vmem>>, vector<16x8xf32>
    %c0_1 = arith.constant 0 : index
    %c0_2 = arith.constant 0 : index
    %1 = vector.load %arg3[%c0_1, %c0_2] : memref<16x1xf32, #tpu.memory_space<vmem>>, vector<16x1xf32>
    %c0_3 = arith.constant 0 : index
    %c0_4 = arith.constant 0 : index
    %2 = vector.load %arg0[%c0_3, %c0_4] : memref<16x16xbf16, #tpu.memory_space<vmem>>, vector<16x16xbf16>
    %3 = arith.truncf %0 : vector<16x8xf32> to vector<16x8xbf16>
    %cst = arith.constant dense<0.000000e+00> : vector<16x8xf32>
    %4 = tpu.matmul %2, %3, %cst {dimension_numbers = #tpu.dot_dimension_numbers<[1], [0], [0], [1], [0, 0, 1, 1], [], []>} : vector<16x16xbf16>, vector<16x8xbf16>, vector<16x8xf32> -> vector<16x8xf32>
    %c0_5 = arith.constant 0 : index
    %c0_6 = arith.constant 0 : index
    %5 = vector.load %arg4[%c0_5, %c0_6] : memref<8x32xf32, #tpu.memory_space<vmem>>, vector<8x32xf32>
    %cst_7 = arith.constant dense<0.000000e+00> : vector<16x32xf32>
    %6 = tpu.matmul %0, %5, %cst_7 {dimension_numbers = #tpu.dot_dimension_numbers<[1], [0], [0], [1], [0, 0, 1, 1], [], []>} : vector<16x8xf32>, vector<8x32xf32>, vector<16x32xf32> -> vector<16x32xf32>
    %c0_8 = arith.constant 0 : index
    %c0_9 = arith.constant 0 : index
    %7 = vector.load %arg5[%c0_8, %c0_9] : memref<8x32xf32, #tpu.memory_space<vmem>>, vector<8x32xf32>
    %cst_10 = arith.constant dense<0.000000e+00> : vector<16x32xf32>
    %8 = tpu.matmul %4, %7, %cst_10 {dimension_numbers = #tpu.dot_dimension_numbers<[1], [0], [0], [1], [0, 0, 1, 1], [], []>} : vector<16x8xf32>, vector<8x32xf32>, vector<16x32xf32> -> vector<16x32xf32>
    %9 = arith.addf %6, %8 : vector<16x32xf32>
    %c0_11 = arith.constant 0 : index
    %c0_12 = arith.constant 0 : index
    %10 = vector.load %arg2[%c0_11, %c0_12] : memref<16x8xf32, #tpu.memory_space<vmem>>, vector<16x8xf32>
    %c0_13 = arith.constant 0 : index
    %c0_14 = arith.constant 0 : index
    %11 = vector.load %arg6[%c0_13, %c0_14] : memref<8x32xf32, #tpu.memory_space<vmem>>, vector<8x32xf32>
    %cst_15 = arith.constant dense<0.000000e+00> : vector<16x32xf32>
    %12 = tpu.matmul %10, %11, %cst_15 {dimension_numbers = #tpu.dot_dimension_numbers<[1], [0], [0], [1], [0, 0, 1, 1], [], []>} : vector<16x8xf32>, vector<8x32xf32>, vector<16x32xf32> -> vector<16x32xf32>
    %13 = arith.addf %9, %12 : vector<16x32xf32>
    %c0_16 = arith.constant 0 : index
    %c0_17 = arith.constant 0 : index
    %14 = vector.load %arg7[%c0_16, %c0_17] : memref<1x32xf32, #tpu.memory_space<vmem>>, vector<1x32xf32>
    %15 = vector.broadcast %14 : vector<1x32xf32> to vector<16x32xf32>
    %16 = arith.addf %13, %15 : vector<16x32xf32>
    %17 = vector.broadcast %1 : vector<16x1xf32> to vector<16x32xf32>
    %18 = arith.mulf %16, %17 : vector<16x32xf32>
    %c0_18 = arith.constant 0 : index
    %c0_19 = arith.constant 0 : index
    %19 = vector.load %arg16[%c0_18, %c0_19] : memref<16x32xf32, #tpu.memory_space<vmem>>, vector<16x32xf32>
    tpu.vector_store %arg16[%c0_18, %c0_19], %18 {strides = array<i32>} : memref<16x32xf32, #tpu.memory_space<vmem>>, vector<16x32xf32>,
    %cst_20 = arith.constant 0.000000e+00 : f32
    %20 = vector.broadcast %cst_20 : f32 to vector<16x32xf32>
    %c0_21 = arith.constant 0 : index
    %c0_22 = arith.constant 0 : index
    %21 = vector.load %arg15[%c0_21, %c0_22] : memref<16x32xf32, #tpu.memory_space<vmem>>, vector<16x32xf32>
    tpu.vector_store %arg15[%c0_21, %c0_22], %20 {strides = array<i32>} : memref<16x32xf32, #tpu.memory_space<vmem>>, vector<16x32xf32>,
    %c0_i32 = arith.constant 0 : i32
    %c0_23 = arith.constant 0 : index
    %22 = memref.load %arg17[%c0_23] : memref<1xi32, #tpu.memory_space<smem>>
    memref.store %c0_i32, %arg17[%c0_23] : memref<1xi32, #tpu.memory_space<smem>>
    %c0_i32_24 = arith.constant 0 : i32
    %c0_25 = arith.constant 0 : index
    %23 = memref.load %arg18[%c0_25] : memref<1xi32, #tpu.memory_space<smem>>
    memref.store %c0_i32_24, %arg18[%c0_25] : memref<1xi32, #tpu.memory_space<smem>>
    %cst_26 = arith.constant 9.99999974E-6 : f32
    %cst_27 = arith.constant 9.99999974E-6 : f32
    %24 = arith.mulf %cst_26, %cst_27 : f32
    %cst_28 = arith.constant 0.899999976 : f32
    %cst_29 = arith.constant 1.000000e-01 : f32
    %c0_i32_30 = arith.constant 0 : i32
    %c20_i32 = arith.constant 20 : i32
    %25 = arith.addi %c0_i32_30, %c20_i32 : i32
    %c1_i32 = arith.constant 1 : i32
    scf.for %arg19 = %c0_i32_30 to %25 step %c1_i32  : i32 {
      %c0_58 = arith.constant 0 : index
      %52 = memref.load %arg18[%c0_58] : memref<1xi32, #tpu.memory_space<smem>>
      %c0_i32_59 = arith.constant 0 : i32
      %53 = arith.cmpi eq, %52, %c0_i32_59 : i32
      %54 = arith.extui %53 : i1 to i32
      %c0_i32_60 = arith.constant 0 : i32
      %55 = arith.cmpi ne, %54, %c0_i32_60 : i32
      scf.if %55 {
        %c0_61 = arith.constant 0 : index
        %c0_62 = arith.constant 0 : index
        %56 = vector.load %arg15[%c0_61, %c0_62] : memref<16x32xf32, #tpu.memory_space<vmem>>, vector<16x32xf32>
        %c0_63 = arith.constant 0 : index
        %c0_64 = arith.constant 0 : index
        %57 = vector.load %arg8[%c0_63, %c0_64] : memref<32x32xf32, #tpu.memory_space<vmem>>, vector<32x32xf32>
        %cst_65 = arith.constant dense<0.000000e+00> : vector<16x32xf32>
        %58 = tpu.matmul %56, %57, %cst_65 {dimension_numbers = #tpu.dot_dimension_numbers<[1], [0], [0], [1], [0, 0, 1, 1], [], []>} : vector<16x32xf32>, vector<32x32xf32>, vector<16x32xf32> -> vector<16x32xf32>
        %c0_66 = arith.constant 0 : index
        %c0_67 = arith.constant 0 : index
        %59 = vector.load %arg0[%c0_66, %c0_67] : memref<16x16xbf16, #tpu.memory_space<vmem>>, vector<16x16xbf16>
        %60 = arith.truncf %58 : vector<16x32xf32> to vector<16x32xbf16>
        %cst_68 = arith.constant dense<0.000000e+00> : vector<16x32xf32>
        %61 = tpu.matmul %59, %60, %cst_68 {dimension_numbers = #tpu.dot_dimension_numbers<[1], [0], [0], [1], [0, 0, 1, 1], [], []>} : vector<16x16xbf16>, vector<16x32xbf16>, vector<16x32xf32> -> vector<16x32xf32>
        %c0_69 = arith.constant 0 : index
        %c0_70 = arith.constant 0 : index
        %62 = vector.load %arg16[%c0_69, %c0_70] : memref<16x32xf32, #tpu.memory_space<vmem>>, vector<16x32xf32>
        %63 = arith.addf %61, %62 : vector<16x32xf32>
        %64 = vector.broadcast %cst_28 : f32 to vector<16x32xf32>
        %65 = arith.mulf %64, %56 : vector<16x32xf32>
        %cst_71 = arith.constant 0.000000e+00 : f32
        %66 = vector.broadcast %cst_71 : f32 to vector<16x32xf32>
        %67 = arith.maximumf %63, %66 : vector<16x32xf32>
        %68 = vector.broadcast %cst_29 : f32 to vector<16x32xf32>
        %69 = arith.mulf %68, %67 : vector<16x32xf32>
        %70 = arith.addf %65, %69 : vector<16x32xf32>
        %71 = arith.subf %56, %70 : vector<16x32xf32>
        %72 = arith.mulf %71, %71 : vector<16x32xf32>
        %73 = vector.shape_cast %72 : vector<16x32xf32> to vector<1x16x32xf32>
        %cst_72 = arith.constant dense<0.000000e+00> : vector<1xf32>
        %74 = vector.multi_reduction <add>, %73, %cst_72 [1, 2] : vector<1x16x32xf32> to vector<1xf32>
        %75 = vector.shape_cast %74 : vector<1xf32> to vector<1x1x1xf32>
        %76 = vector.extract %75[0, 0, 0] : f32 from vector<1x1x1xf32>
        %77 = arith.cmpf olt, %76, %24 : f32
        %78 = arith.extui %77 : i1 to i32
        %c0_i32_73 = arith.constant 0 : i32
        %79 = arith.cmpi ne, %78, %c0_i32_73 : i32
        scf.if %79 {
          %c1_i32_75 = arith.constant 1 : i32
          %c0_76 = arith.constant 0 : index
          %83 = memref.load %arg18[%c0_76] : memref<1xi32, #tpu.memory_space<smem>>
          memref.store %c1_i32_75, %arg18[%c0_76] : memref<1xi32, #tpu.memory_space<smem>>
        } else {
        }
        %true = arith.constant true
        %80 = arith.xori %77, %true : i1
        %81 = arith.extui %80 : i1 to i32
        %c0_i32_74 = arith.constant 0 : i32
        %82 = arith.cmpi ne, %81, %c0_i32_74 : i32
        scf.if %82 {
          %c0_75 = arith.constant 0 : index
          %c0_76 = arith.constant 0 : index
          %83 = vector.load %arg15[%c0_75, %c0_76] : memref<16x32xf32, #tpu.memory_space<vmem>>, vector<16x32xf32>
          tpu.vector_store %arg15[%c0_75, %c0_76], %70 {strides = array<i32>} : memref<16x32xf32, #tpu.memory_space<vmem>>, vector<16x32xf32>,
          %c0_77 = arith.constant 0 : index
          %84 = memref.load %arg17[%c0_77] : memref<1xi32, #tpu.memory_space<smem>>
          %c1_i32_78 = arith.constant 1 : i32
          %85 = arith.addi %84, %c1_i32_78 : i32
          %c0_79 = arith.constant 0 : index
          %86 = memref.load %arg17[%c0_79] : memref<1xi32, #tpu.memory_space<smem>>
          memref.store %85, %arg17[%c0_79] : memref<1xi32, #tpu.memory_space<smem>>
        } else {
        }
      } else {
      }
    }
    %c0_31 = arith.constant 0 : index
    %c0_32 = arith.constant 0 : index
    %26 = vector.load %arg15[%c0_31, %c0_32] : memref<16x32xf32, #tpu.memory_space<vmem>>, vector<16x32xf32>
    %c0_33 = arith.constant 0 : index
    %c0_34 = arith.constant 0 : index
    %27 = vector.load %arg8[%c0_33, %c0_34] : memref<32x32xf32, #tpu.memory_space<vmem>>, vector<32x32xf32>
    %cst_35 = arith.constant dense<0.000000e+00> : vector<16x32xf32>
    %28 = tpu.matmul %26, %27, %cst_35 {dimension_numbers = #tpu.dot_dimension_numbers<[1], [0], [0], [1], [0, 0, 1, 1], [], []>} : vector<16x32xf32>, vector<32x32xf32>, vector<16x32xf32> -> vector<16x32xf32>
    %c0_36 = arith.constant 0 : index
    %c0_37 = arith.constant 0 : index
    %29 = vector.load %arg0[%c0_36, %c0_37] : memref<16x16xbf16, #tpu.memory_space<vmem>>, vector<16x16xbf16>
    %30 = arith.truncf %28 : vector<16x32xf32> to vector<16x32xbf16>
    %cst_38 = arith.constant dense<0.000000e+00> : vector<16x32xf32>
    %31 = tpu.matmul %29, %30, %cst_38 {dimension_numbers = #tpu.dot_dimension_numbers<[1], [0], [0], [1], [0, 0, 1, 1], [], []>} : vector<16x16xbf16>, vector<16x32xbf16>, vector<16x32xf32> -> vector<16x32xf32>
    %c0_39 = arith.constant 0 : index
    %c0_40 = arith.constant 0 : index
    %32 = vector.load %arg16[%c0_39, %c0_40] : memref<16x32xf32, #tpu.memory_space<vmem>>, vector<16x32xf32>
    %33 = arith.addf %31, %32 : vector<16x32xf32>
    %cst_41 = arith.constant 0.000000e+00 : f32
    %34 = vector.broadcast %cst_41 : f32 to vector<16x32xf32>
    %35 = arith.maximumf %33, %34 : vector<16x32xf32>
    %c0_42 = arith.constant 0 : index
    %c0_43 = arith.constant 0 : index
    %36 = vector.load %arg9[%c0_42, %c0_43] : memref<32x32xf32, #tpu.memory_space<vmem>>, vector<32x32xf32>
    %cst_44 = arith.constant dense<0.000000e+00> : vector<16x32xf32>
    %37 = tpu.matmul %35, %36, %cst_44 {dimension_numbers = #tpu.dot_dimension_numbers<[1], [0], [0], [1], [0, 0, 1, 1], [], []>} : vector<16x32xf32>, vector<32x32xf32>, vector<16x32xf32> -> vector<16x32xf32>
    %c0_45 = arith.constant 0 : index
    %c0_46 = arith.constant 0 : index
    %38 = vector.load %arg10[%c0_45, %c0_46] : memref<1x32xf32, #tpu.memory_space<vmem>>, vector<1x32xf32>
    %39 = vector.broadcast %38 : vector<1x32xf32> to vector<16x32xf32>
    %40 = arith.addf %37, %39 : vector<16x32xf32>
    %cst_47 = arith.constant 0.000000e+00 : f32
    %41 = vector.broadcast %cst_47 : f32 to vector<16x32xf32>
    %42 = arith.maximumf %40, %41 : vector<16x32xf32>
    %c0_48 = arith.constant 0 : index
    %c0_49 = arith.constant 0 : index
    %43 = vector.load %arg11[%c0_48, %c0_49] : memref<32x128xf32, #tpu.memory_space<vmem>>, vector<32x128xf32>
    %cst_50 = arith.constant dense<0.000000e+00> : vector<16x128xf32>
    %44 = tpu.matmul %42, %43, %cst_50 {dimension_numbers = #tpu.dot_dimension_numbers<[1], [0], [0], [1], [0, 0, 1, 1], [], []>} : vector<16x32xf32>, vector<32x128xf32>, vector<16x128xf32> -> vector<16x128xf32>
    %c0_51 = arith.constant 0 : index
    %c0_52 = arith.constant 0 : index
    %45 = vector.load %arg12[%c0_51, %c0_52] : memref<1x128xf32, #tpu.memory_space<vmem>>, vector<1x128xf32>
    %46 = vector.broadcast %45 : vector<1x128xf32> to vector<16x128xf32>
    %47 = arith.addf %44, %46 : vector<16x128xf32>
    %c0_53 = arith.constant 0 : index
    %c0_54 = arith.constant 0 : index
    %48 = vector.load %arg13[%c0_53, %c0_54] : memref<16x128xf32, #tpu.memory_space<vmem>>, vector<16x128xf32>
    tpu.vector_store %arg13[%c0_53, %c0_54], %47 {strides = array<i32>} : memref<16x128xf32, #tpu.memory_space<vmem>>, vector<16x128xf32>,
    %c0_55 = arith.constant 0 : index
    %49 = memref.load %arg17[%c0_55] : memref<1xi32, #tpu.memory_space<smem>>
    %50 = vector.broadcast %49 : i32 to vector<1x1xi32>
    %c0_56 = arith.constant 0 : index
    %c0_57 = arith.constant 0 : index
    %51 = vector.load %arg14[%c0_56, %c0_57] : memref<1x1xi32, #tpu.memory_space<vmem>>, vector<1x1xi32>
    tpu.vector_store %arg14[%c0_56, %c0_57], %50 {strides = array<i32>} : memref<1x1xi32, #tpu.memory_space<vmem>>, vector<1x1xi32>,
    return
  }
}

</mosaic_0001>

<bundles_post_ra>
// kernel: sse_forward.1
= control target key start
LH: loop header
LB: loop body
LE: loop exit
PB: predicated region body
PF: predicated region fallthrough
CT: control target
= control target key end

     0   :  { %20 = vsyncpa [#allocation7], 0  ;;  %v1126_v2 = vmov 0.0   ;;  %vm1127_vm0 = vmmov 0   ;;  %vm60_vm1 = vcmask 130048   ;;  %v1128_v8 = vmov 0   ;;  %s1352_s0 = inlined_call_operand.vmem [shape: bf16[16,16], index: 0, kind: input, shape index: {}]   ;;  %s1353_s1 = inlined_call_operand.vmem [shape: f32[16,8], index: 1, kind: input, shape index: {}]   ;;  %s1354_s2 = inlined_call_operand.vmem [shape: f32[16,8], index: 2, kind: input, shape index: {}]   ;;  %s1355_s3 = inlined_call_operand.vmem [shape: f32[16,1], index: 3, kind: input, shape index: {}]   ;;  %s1356_s4 = inlined_call_operand.vmem [shape: f32[8,32], index: 4, kind: input, shape index: {}]   ;;  %s1357_s5 = inlined_call_operand.vmem [shape: f32[8,32], index: 5, kind: input, shape index: {}]   ;;  %s1358_s6 = inlined_call_operand.vmem [shape: f32[8,32], index: 6, kind: input, shape index: {}]   ;;  %s1359_s7 = inlined_call_operand.vmem [shape: f32[1,32], index: 7, kind: input, shape index: {}]   ;;  %s1360_s8 = inlined_call_operand.vmem [shape: f32[32,32], index: 8, kind: input, shape index: {}]   ;;  %s1361_s9 = inlined_call_operand.vmem [shape: f32[32,32], index: 9, kind: input, shape index: {}]   ;;  %s1362_s10 = inlined_call_operand.vmem [shape: f32[1,32], index: 10, kind: input, shape index: {}]   ;;  %s1363_s11 = inlined_call_operand.vmem [shape: f32[32,128], index: 11, kind: input, shape index: {}]   ;;  %s1364_s12 = inlined_call_operand.vmem [shape: f32[1,128], index: 12, kind: input, shape index: {}]   ;;  %s1365_s13 = inlined_call_operand.vmem [shape: f32[16,128], index: 13, kind: output, shape index: {0}]   ;;  %s1366_s14 = inlined_call_operand.hbm [shape: s32[1,1], index: 14, kind: output, shape index: {1}]  }
   0x1   :  { %v48_v0 = vld [vmem:[%s1353_s1] sm:$0xff]  ;;  %v49_v1 = vld [vmem:[%s1353_s1 + $0x8] sm:$0xff]  ;;  %996 = vmatprep.subr.bf16.mxu0 %v1126_v2  ;;  %998 = vmatprep.mubr.msk.bf16.mxu0 %vm1127_vm0, %v1126_v2  ;;  %vm107_vm2 = vcmask 64512   ;;  %vm377_vm3 = vcmask 261120   ;;  %s1258_s30 = smov 0  }
   0x2   :  { %v54_v3 = vpack.c.bf16 %v49_v1, %v48_v0  ;;  %v1093_v4 = vld [vmem:[%s1352_s0] sm:$0xff]   ;;  %1092 = vset.pattern.permute.xlu0 %v1128_v8  ;;  %v51_v9 = vld [vmem:[%s1355_s3 + $0x8] sm:$0xff]  ;;  %380 = vst.msk [vmem:[#allocation2] sm:$0xff] %vm377_vm3, %v1126_v2  ;;  %381 = vst.msk [vmem:[#allocation2 + $0x8] sm:$0xff] %vm377_vm3, %v1126_v2 }
   0x3   :  { %v106_v5 = vld [vmem:[%s1357_s5] sm:$0xff]  ;;  %v271_v16 = vld [vmem:[%s1354_s2 + $0x8] sm:$0xff] }
   0x4   :  { %997 = vmatpush3.bf16.msra.mxu0 %v54_v3  ;;  %1002 = vmatprep.subr.mxu1 %v106_v5  ;;  %v105_v6 = vld [vmem:[%s1356_s4] sm:$0xff] }
   0x5   :  { %1003 = vmatpush3.msra.mxu1 %v106_v5  ;;  %v50_v7 = vld [vmem:[%s1355_s3] sm:$0xff] }
   0x6   :  { %1007 = vmatprep.subr.mxu1 %v105_v6  ;;  %367 = vperm.xlu0 %1092, %v50_v7   ;;  %v272_v13 = vld [vmem:[%s1358_s6] sm:$0xff]  ;;  %s1129_s6 = smov 0  }
   0x7   :  { %999 = vmatmul.mubr.msk.bf16.vlgmr.msra.gmra.mxu0 %vm60_vm1, %v1093_v4  ;;  %v270_v15 = vld [vmem:[%s1354_s2] sm:$0xff]  ;;  %383 = sst [smem:[#allocation4]] %s1129_s6 }
   0x8   :  { %385 = sst [smem:[#allocation5]] %s1129_s6  ;;  %v941_v24 = vld [vmem:[%s1359_s7] ss:$0 sm:$0xff] }
   0xa   :  { %372 = vperm.xlu0 %1092, %v51_v9  }
  0x81   :  { %v368_v20 = vpop.permute.xlu0 %367 }
  0x85   :  { %v373_v30 = vpop.permute.xlu0 %372 }
  0xc7   :  { %v98_v10 = vpop.f32.mrf.mxu0 }
  0xc8   :  { %1004 = vmatprep.mubr.msk.f32.mxu1 %vm107_vm2, %v98_v10 }
  0xc9   :  { %v1000_v11 = vpop.f32.mrf.mxu0 }
  0xcb   :  { %v101_v12 = vpop.f32.mrf.mxu0 }
  0xcc   :  { %1005 = vmatmul.mubr.msk.f32.vlgmr.msra.gmra.mxu1 %vm107_vm2, %v101_v12 }
  0xcd   :  { %1008 = vmatpush3.msra.mxu1 %v105_v6  ;;  %v1001_v14 = vpop.f32.mrf.mxu0  ;;  %1009 = vmatprep.mubr.msk.f32.mxu1 %vm107_vm2, %v48_v0 }
  0xce   :  { %1012 = vmatprep.subr.mxu1 %v272_v13 }
  0xd0   :  { %1010 = vmatmul.mubr.msk.f32.vlgmr.msra.gmra.mxu1 %vm107_vm2, %v49_v1 }
  0xd1   :  { %1013 = vmatpush3.msra.mxu1 %v272_v13  ;;  %1014 = vmatprep.mubr.msk.f32.mxu1 %vm107_vm2, %v270_v15 }
  0xd4   :  { %1015 = vmatmul.mubr.msk.f32.vlgmr.msra.gmra.mxu1 %vm107_vm2, %v271_v16 }
 0x18c   :  { %v1006_v17 = vpop.f32.mrf.mxu1 }
 0x18e   :  { %v180_v18 = vpop.f32.mrf.mxu1 }
 0x190   :  { %v1011_v19 = vpop.f32.mrf.mxu1 }
 0x191   :  { %v267_v22 = vadd.f32 %v1011_v19, %v1006_v17 }
 0x192   :  { %v261_v21 = vpop.f32.mrf.mxu1 }
 0x193   :  { %v262_v25 = vadd.f32 %v261_v21, %v180_v18 }
 0x194   :  { %v1016_v23 = vpop.f32.mrf.mxu1 }
 0x195   :  { %v355_v26 = vadd.f32 %v1016_v23, %v267_v22 }
 0x196   :  { %v345_v27 = vpop.f32.mrf.mxu1 }
 0x197   :  { %v364_v28 = vadd.f32 %v941_v24, %v355_v26  ;;  %v354_v29 = vadd.f32 %v345_v27, %v262_v25 }
 0x199   :  { %v376_v31 = vmul.f32 %v373_v30, %v364_v28  ;;  %v363_v32 = vadd.f32 %v941_v24, %v354_v29 }
 0x19b   :  { %379 = vst.msk [vmem:[#allocation3 + $0x8] sm:$0xff] %vm377_vm3, %v376_v31  ;;  %v375_v33 = vmul.f32 %v368_v20, %v363_v32 }
 0x19d   :  { %378 = vst.msk [vmem:[#allocation3] sm:$0xff] %vm377_vm3, %v375_v33 }
 0x19e LB: > { %s392_s7 = sld [smem:[#allocation5]]  ;;  %s1124_s30 = sphi %s1258_s30, %s391_s30  }
 0x1a4   : > { %p942_p0 = scmp.ne.s32.totalorder %s392_s7, 0 }
 0x1a5   : > { %s1132_s25 = smov (!%p942_p0), 1  }
 0x1a6   : > { %396 = sbr.rel (%p942_p0) target bundleno = 1057 (0x421), region = 64 }
 0x1ab   : > { %v402_v34 = vld [vmem:[%s1360_s8 + $0x18] sm:$0xff]  ;;  %v401_v35 = vld [vmem:[%s1360_s8 + $0x10] sm:$0xff]  ;;  %v397_v36 = vld [vmem:[#allocation2] sm:$0xff]  ;;  %v1130_v40 = vmov 0.0   ;;  %vm1131_vm4 = vmmov 0  }
 0x1ac   : > { %1017 = vmatprep.subr.mxu0 %v402_v34  ;;  %v400_v37 = vld [vmem:[%s1360_s8 + $0x8] sm:$0xff]  ;;  %1025 = vmatprep.mubr.msk.f32.mxu0 %vm377_vm3, %v397_v36  ;;  %v399_v38 = vld [vmem:[%s1360_s8] sm:$0xff]  ;;  %v487_v45 = vld [vmem:[#allocation3] sm:$0xff]  ;;  %v538_v50 = vmul.f32 0.9, %v397_v36 }
 0x1ad   : > { %1018 = vmatpush3.msra.mxu0 %v402_v34  ;;  %v398_v39 = vld [vmem:[#allocation2 + $0x8] sm:$0xff]  ;;  %1028 = vmatprep.subr.bf16.mxu1 %v1130_v40  ;;  %v1094_v44 = vld [vmem:[%s1352_s0] sm:$0xff]   ;;  %v488_v49 = vld [vmem:[#allocation3 + $0x8] sm:$0xff] }
 0x1ae   : > { %1019 = vmatprep.subr.mxu0 %v401_v35  ;;  %1030 = vmatprep.mubr.msk.bf16.mxu1 %vm1131_vm4, %v1130_v40  ;;  %v539_v56 = vmul.f32 0.9, %v398_v39 }
 0x1af   : > { %1020 = vmatpush3.msra.mxu0 %v401_v35 }
 0x1b0   : > { %1021 = vmatprep.subr.mxu0 %v400_v37 }
 0x1b1   : > { %1022 = vmatpush3.msra.mxu0 %v400_v37 }
 0x1b2   : > { %1023 = vmatprep.subr.mxu0 %v399_v38 }
 0x1b3   : > { %1024 = vmatpush3.msra.mxu0 %v399_v38 }
 0x1b4   : > { %1026 = vmatmul.mubr.msk.f32.vlgmr.msra.gmra.mxu0 %vm377_vm3, %v398_v39 }
 0x274   : > { %v1027_v41 = vpop.f32.mrf.mxu0 }
 0x276   : > { %v475_v42 = vpop.f32.mrf.mxu0 }
 0x277   : > { %v486_v43 = vpack.c.bf16 %v1027_v41, %v475_v42 }
 0x279   : > { %1029 = vmatpush3.bf16.msra.mxu1 %v486_v43 }
 0x27c   : > { %1031 = vmatmul.mubr.msk.bf16.vlgmr.msra.gmra.mxu1 %vm60_vm1, %v1094_v44 }
 0x33c   : > { %v531_v46 = vpop.f32.mrf.mxu1 }
 0x33d   : > { %v532_v47 = vadd.f32 %v531_v46, %v487_v45 }
 0x33e   : > { %v1032_v48 = vpop.f32.mrf.mxu1 }
 0x33f   : > { %v540_v51 = vmax.f32 %v532_v47, 0.0 }
 0x340   : > { %v534_v52 = vpop.f32.mrf.mxu1 }
 0x341   : > { %v542_v53 = vmul.f32 0.1, %v540_v51  ;;  %v535_v54 = vadd.f32 %v534_v52, %v488_v49 }
 0x342   : > { %v1033_v55 = vpop.f32.mrf.mxu1 }
 0x343   : > { %v544_v57 = vadd.f32 %v542_v53, %v538_v50  ;;  %v541_v58 = vmax.f32 %v535_v54, 0.0 }
 0x345   : > { %v543_v59 = vmul.f32 0.1, %v541_v58  ;;  %v546_v60 = vsub.f32 %v397_v36, %v544_v57 }
 0x347   : > { %v545_v61 = vadd.f32 %v543_v59, %v539_v56  ;;  %v548_v63 = vmul.f32 %v546_v60, %v546_v60 }
 0x349   : > { %v547_v62 = vsub.f32 %v398_v39, %v545_v61  ;;  %v550_v1 = vsel %vm377_vm3, %v548_v63, 0.0 }
 0x34b   : > { %v549_v0 = vmul.f32 %v547_v62, %v547_v62 }
 0x34d   : > { %v551_v3 = vsel %vm377_vm3, %v549_v0, 0.0 }
 0x34e   : > { %v552_v4 = vadd.f32 %v551_v3, %v550_v1 }
 0x350   : > { %553 = vadd.xlane.f32.xlu0 %v552_v4 }
 0x3d9   : > { %v554_v5 = vpop.xlane.xlu0 %553 }
 0x3da   : > { %v555_v6 = vrot.slane %v554_v5, 4 }
 0x3dc   : > { %v556_v7 = vadd.f32 %v555_v6, %v554_v5 }
 0x3de   : > { %v557_v8 = vrot.slane %v556_v7, 2 }
 0x3e0   : > { %v558_v9 = vadd.f32 %v557_v8, %v556_v7 }
 0x3e2   : > { %v559_v10 = vrot.slane %v558_v9, 1 }
 0x3e4   : > { %v560_v11 = vadd.f32 %v559_v10, %v558_v9 }
 0x3e6   : > { %1073 = vpush %v560_v11 }
 0x417   : > { %s1074_s24 = spop %1073 }
 0x418   : > { %p562_p1 = scmp.lt.f32.partialorder %s1074_s24, 9.9999994e-11 }
 0x419   : > { %s572_s4 = sld [smem:[#allocation4]] (!%p562_p1) }
 0x41a   : > { %1075 = sst [smem:[#allocation5]] (%p562_p1), %s1132_s25  ;;  %569 = sbr.rel (%p562_p1) target bundleno = 1057 (0x421), region = 72 }
 0x41f   : > { %570 = vst.msk [vmem:[#allocation2] sm:$0xff] %vm377_vm3, %v544_v57  ;;  %571 = vst.msk [vmem:[#allocation2 + $0x8] sm:$0xff] %vm377_vm3, %v545_v61  ;;  %s573_s5 = sadd.s32 1, %s572_s4 }
 0x420   : > { %574 = sst [smem:[#allocation4]] %s573_s5 }
 0x421 PF: > { %s391_s30 = sadd.s32 1, %s1124_s30  }
 0x422   : > { %p388_p2 = scmp.ge.s32.totalorder %s391_s30, 20  }
 0x423   :  { %v580_v12 = vld [vmem:[%s1360_s8 + $0x18] sm:$0xff] (%p388_p2)  ;;  %v579_v13 = vld [vmem:[%s1360_s8 + $0x10] sm:$0xff] (%p388_p2)  ;;  %1045 = vmatprep.subr.bf16.mxu1 (%p388_p2), %v1126_v2  ;;  %1047 = vmatprep.mubr.msk.bf16.mxu1 (%p388_p2), %vm1127_vm0, %v1126_v2  ;;  %v578_v15 = vld [vmem:[%s1360_s8 + $0x8] sm:$0xff] (%p388_p2)  ;;  %s906_s27 = sld [smem:[#allocation4]] (%p388_p2)  ;;  %vm908_vm5 = vcmask (%p388_p2), 0  }
 0x424   :  { %390 = sbr.rel (!%p388_p2) target bundleno = 414 (0x19e), region = 101  ;;  %1034 = vmatprep.subr.mxu0 (%p388_p2), %v580_v12  ;;  %v577_v16 = vld [vmem:[%s1360_s8] sm:$0xff] (%p388_p2)  ;;  %v721_v21 = vld [vmem:[%s1361_s9 + $0x18] sm:$0xff] (%p388_p2)  ;;  %v720_v22 = vld [vmem:[%s1361_s9 + $0x10] sm:$0xff] (%p388_p2) }
 0x425   :  { %1035 = vmatpush3.msra.mxu0 (%p388_p2), %v580_v12  ;;  %v1095_v20 = vld [vmem:[%s1352_s0] sm:$0xff] (%p388_p2)   ;;  %v719_v23 = vld [vmem:[%s1361_s9 + $0x8] sm:$0xff] (%p388_p2)  ;;  %v665_v25 = vld [vmem:[#allocation3] sm:$0xff] (%p388_p2) }
 0x426   :  { %1036 = vmatprep.subr.mxu0 (%p388_p2), %v579_v13  ;;  %v718_v24 = vld [vmem:[%s1361_s9] sm:$0xff] (%p388_p2)  ;;  %v666_v29 = vld [vmem:[#allocation3 + $0x8] sm:$0xff] (%p388_p2)  ;;  %v814_v36 = vld [vmem:[%s1363_s11 + $0x10] sm:$0xff] (%p388_p2) }
 0x427   :  { %1037 = vmatpush3.msra.mxu0 (%p388_p2), %v579_v13  ;;  %v815_v35 = vld [vmem:[%s1363_s11 + $0x18] sm:$0xff] (%p388_p2)  ;;  %v813_v37 = vld [vmem:[%s1363_s11 + $0x8] sm:$0xff] (%p388_p2)  ;;  %v812_v38 = vld [vmem:[%s1363_s11] sm:$0xff] (%p388_p2)  ;;  %s1133_s11 = smov (%p388_p2), [#allocation6]  }
 0x428   :  { %v575_v14 = vld [vmem:[#allocation2] sm:$0xff] (%p388_p2)  ;;  %1038 = vmatprep.subr.mxu0 (%p388_p2), %v578_v15  ;;  %v576_v17 = vld [vmem:[#allocation2 + $0x8] sm:$0xff] (%p388_p2)  ;;  %s918_s28 = sshll.u32 (%p388_p2), %s1133_s11, 4  ;;  %s919_s28 = int_to_ptr.vmem [resolvable:$true] %s918_s28 }
 0x429   :  { %1042 = vmatprep.mubr.msk.f32.mxu0 %vm377_vm3, %v575_v14  ;;  %1039 = vmatpush3.msra.mxu0 %v578_v15  ;;  %v951_v39 = vld [vmem:[%s1362_s10] ss:$0 sm:$0xff]  ;;  %v907_v46 = vstv %s906_s27  ;;  %s1096_s6 = scalar_lea.vmem %s919_s28, 16  ;;  %s1100_s10 = scalar_lea.vmem %s919_s28, 32 }
 0x42a   :  { %1040 = vmatprep.subr.mxu0 %v577_v16  ;;  %909 = vst.msk [vmem:[#allocation6] sm:$0x1] %vm908_vm5, %v907_v46  ;;  %p1097_p3 = scmp.ne.s32.totalorder %s919_s28, %s1096_s6  ;;  %p1101_p4 = scmp.lt.s32.totalorder %s919_s28, %s919_s28 }
 0x42b   :  { %1041 = vmatpush3.msra.mxu0 %v577_v16  ;;  %p1102_p5 = scmp.lt.s32.totalorder %s1100_s10, %s1096_s6 }
 0x42c   :  { %1043 = vmatmul.mubr.msk.f32.vlgmr.msra.gmra.mxu0 %vm377_vm3, %v576_v17  ;;  %1062 = vmatprep.subr.mxu0 %v815_v35 }
 0x42d   :  { %1063 = vmatpush3.msra.mxu0 %v815_v35  ;;  %p1103_p6 = por %p1102_p5, %p1101_p4 }
 0x42e   :  { %1064 = vmatprep.subr.mxu0 %v814_v36 }
 0x42f   :  { %1065 = vmatpush3.msra.mxu0 %v814_v36  ;;  %p1104_p7 = pnand %p1103_p6, %p1097_p3 }
 0x430   :  { %1066 = vmatprep.subr.mxu0 %v813_v37 }
 0x431   :  { %1067 = vmatpush3.msra.mxu0 %v813_v37 }
 0x432   :  { %1068 = vmatprep.subr.mxu0 %v812_v38 }
 0x433   :  { %1069 = vmatpush3.msra.mxu0 %v812_v38 }
 0x4ec   :  { %v1044_v2 = vpop.f32.mrf.mxu0 }
 0x4ee   :  { %v653_v18 = vpop.f32.mrf.mxu0 }
 0x4ef   :  { %v664_v19 = vpack.c.bf16 %v1044_v2, %v653_v18 }
 0x4f1   :  { %1046 = vmatpush3.bf16.msra.mxu1 %v664_v19 }
 0x4f2   :  { %1051 = vmatprep.subr.mxu1 %v721_v21 }
 0x4f4   :  { %1048 = vmatmul.mubr.msk.bf16.vlgmr.msra.gmra.mxu1 %vm60_vm1, %v1095_v20 }
 0x4f5   :  { %1052 = vmatpush3.msra.mxu1 %v721_v21 }
 0x4f6   :  { %1053 = vmatprep.subr.mxu1 %v720_v22 }
 0x4f7   :  { %1054 = vmatpush3.msra.mxu1 %v720_v22 }
 0x4f8   :  { %1055 = vmatprep.subr.mxu1 %v719_v23 }
 0x4f9   :  { %1056 = vmatpush3.msra.mxu1 %v719_v23 }
 0x4fa   :  { %1057 = vmatprep.subr.mxu1 %v718_v24 }
 0x4fb   :  { %1058 = vmatpush3.msra.mxu1 %v718_v24 }
 0x5b4   :  { %v709_v26 = vpop.f32.mrf.mxu1 }
 0x5b5   :  { %v710_v27 = vadd.f32 %v709_v26, %v665_v25 }
 0x5b6   :  { %v1049_v28 = vpop.f32.mrf.mxu1 }
 0x5b7   :  { %v716_v30 = vmax.f32 %v710_v27, 0.0 }
 0x5b8   :  { %v712_v31 = vpop.f32.mrf.mxu1 }
 0x5b9   :  { %v713_v32 = vadd.f32 %v712_v31, %v666_v29  ;;  %1059 = vmatprep.mubr.msk.f32.mxu1 %vm377_vm3, %v716_v30 }
 0x5ba   :  { %v1050_v33 = vpop.f32.mrf.mxu1 }
 0x5bb   :  { %v717_v34 = vmax.f32 %v713_v32, 0.0 }
 0x5bd   :  { %1060 = vmatmul.mubr.msk.f32.vlgmr.msra.gmra.mxu1 %vm377_vm3, %v717_v34 }
 0x67d   :  { %v1061_v40 = vpop.f32.mrf.mxu1 }
 0x67e   :  { %v807_v41 = vadd.f32 %v1061_v40, %v951_v39 }
 0x67f   :  { %v801_v42 = vpop.f32.mrf.mxu1 }
 0x680   :  { %v802_v43 = vadd.f32 %v951_v39, %v801_v42  ;;  %v811_v45 = vmax.f32 %v807_v41, 0.0 }
 0x682   :  { %v810_v44 = vmax.f32 %v802_v43, 0.0 }
 0x684   :  { %1070 = vmatprep.mubr.msk.f32.mxu0 %vm377_vm3, %v810_v44 }
 0x685   :  { %1071 = vmatmul.mubr.msk.f32.vlgmr.msra.gmra.mxu0 %vm377_vm3, %v811_v45 }
 0x686   :  { %1107 = shalt.err (!%p1104_p7)
}
 0x687   :  { %921 = dma.vmem_to_hbm [thread:$0]  %s919_s28, 16, %s1366_s14, [#allocation7]   ;;  %v954_v47 = vld [vmem:[%s1364_s12] ss:$0 sm:$0xff] }
 0x745   :  { %v1072_v48 = vpop.f32.mrf.mxu0 }
 0x746   :  { %v901_v49 = vadd.f32 %v1072_v48, %v954_v47 }
 0x747   :  { %v895_v50 = vpop.f32.mrf.mxu0 }
 0x748   :  { %905 = vst [vmem:[%s1365_s13 + $0x8] sm:$0xff] %v901_v49  ;;  %v896_v51 = vadd.f32 %v954_v47, %v895_v50 }
 0x74a   :  { %904 = vst [vmem:[%s1365_s13] sm:$0xff] %v896_v51 }
 0x74b   :  { %1120 = dma.done.wait [#allocation7], 16  }
 0x74c   :  { %1121 = vsyncadd [#allocation7], 4294967280 }
 0x74d   :  { %927 = vsyncpa [#allocation7], 1 }

</bundles_post_ra>
